<compile_context>
chip_gen: v5e
topology: v5e:2x2
jax: 0.10.0
libtpu: 0.0.40
codegen_flags: <defaults>
</compile_context>

<pallas_src>
import jax
import jax.numpy as jnp
from jax.experimental import pallas as pl
from jax.experimental.pallas import tpu as pltpu

_LANE = 128


def _round_up(v, m):
    return ((v + m - 1) // m) * m


def _conv1x1_kernel(x_ref, w_ref, b_ref, o_ref):
    # x_ref: (C_in, tile_hw)   w_ref: (C_out, C_in)
    # b_ref: (C_out, 1)        o_ref: (C_out, tile_hw)
    c_out, c_in = w_ref.shape
    b = b_ref[...].astype(jnp.float32)
    if c_in <= 8:
        # Tiny contraction dim: unrolled VPU broadcast-FMA; avoids MXU
        # push/pop latency (matters most on v5e) in this mem-bound regime.
        x = x_ref[...].astype(jnp.float32)
        w = w_ref[...].astype(jnp.float32)
        acc = jnp.broadcast_to(b, o_ref.shape)
        for k in range(c_in):
            acc = acc + w[:, k:k + 1] * x[k:k + 1, :]
    else:
        acc = jnp.dot(w_ref[...], x_ref[...],
                      preferred_element_type=jnp.float32) + b
    o_ref[...] = acc.astype(o_ref.dtype)


def outconv_pallas(x_nchw, weight, bias, *, tile_hw=None):
    """1x1 Conv2d with bias; semantics identical to nn.Conv2d(in_ch, out_ch, 1).

    x_nchw : (N, C_in, H, W)
    weight : (C_out, C_in, 1, 1)   -- PyTorch conv weight layout
    bias   : (C_out,)
    returns: (N, C_out, H, W)
    """
    N, C_in, H, W = x_nchw.shape
    C_out = weight.shape[0]
    HW = H * W
    itemsize = jnp.dtype(x_nchw.dtype).itemsize

    if tile_hw is None:
        # Big lane-dense tile (amortizes ~0.35us per grid step), capped so
        # double-buffered input+output tiles stay inside a conservative VMEM
        # budget (safe on v7x's smaller scoped VMEM as well as v5e/v6e).
        vmem_budget = 12 * 1024 * 1024
        max_tile = vmem_budget // (2 * (C_in + C_out) * itemsize)
        tile_hw = max(_LANE, min(8192, max_tile))
    # Tile must be a multiple of 128 lanes; never bigger than (padded) H*W.
    tile_hw = _round_up(min(tile_hw, _round_up(HW, _LANE)), _LANE)
    HW_pad = _round_up(HW, tile_hw)

    # Glue: NCHW -> (N, C_in, HW_pad); pad spatial tail instead of asserting
    # divisibility.  No layout transpose needed.
    x_flat = x_nchw.reshape(N, C_in, HW)
    if HW_pad != HW:
        x_flat = jnp.pad(x_flat, ((0, 0), (0, 0), (0, HW_pad - HW)))

    w_mat = weight.reshape(C_out, C_in)   # (C_out, C_in)
    b_mat = bias.reshape(C_out, 1)        # (C_out, 1), broadcasts over lanes

    grid = (N, HW_pad // tile_hw)

    out_flat = pl.pallas_call(
        _conv1x1_kernel,
        out_shape=jax.ShapeDtypeStruct((N, C_out, HW_pad), x_nchw.dtype),
        grid_spec=pl.GridSpec(
            grid=grid,
            in_specs=[
                # Activations: squeeze batch dim, lane axis = H*W.
                pl.BlockSpec((None, C_in, tile_hw), lambda n, j: (n, 0, j)),
                # Weight / bias: constant index map -> resident across grid.
                pl.BlockSpec((C_out, C_in), lambda n, j: (0, 0)),
                pl.BlockSpec((C_out, 1), lambda n, j: (0, 0)),
            ],
            out_specs=pl.BlockSpec((None, C_out, tile_hw),
                                   lambda n, j: (n, 0, j)),
        ),
        compiler_params=pltpu.CompilerParams(
            dimension_semantics=("parallel", "parallel"),
            vmem_limit_bytes=32 * 1024 * 1024,
        ),
    )(x_flat, w_mat, b_mat)

    if HW_pad != HW:
        out_flat = out_flat[:, :, :HW]
    return out_flat.reshape(N, C_out, H, W)


if __name__ == "__main__":
    key = jax.random.PRNGKey(0)
    k_x, k_w, k_b = jax.random.split(key, 3)

    # Small shapes consistent with the module: batch=2, in_ch=4, out_ch=3, 16x16.
    N, C_in, C_out, H, W = 2, 4, 3, 16, 16

    x = jax.random.normal(k_x, (N, C_in, H, W), dtype=jnp.float32)
    # Deterministic synthetic parameters (shapes match nn.Conv2d(in_ch, out_ch, 1)).
    weight = jax.random.normal(k_w, (C_out, C_in, 1, 1), dtype=jnp.float32) * 0.1
    bias = jax.random.normal(k_b, (C_out,), dtype=jnp.float32) * 0.1

    out = outconv_pallas(x, weight, bias)
    out = jax.block_until_ready(out)

    # Reference check (plain JAX einsum over channels, NCHW throughout).
    ref = jnp.einsum("oc,nchw->nohw", weight.reshape(C_out, C_in), x) \
        + bias.reshape(1, C_out, 1, 1)
    assert out.shape == (N, C_out, H, W)
    assert jnp.allclose(out, ref, atol=1e-5, rtol=1e-5)

    print("KERNEL_OK")
</pallas_src>

<mosaic_0001>
module attributes {stable_mosaic.version = 11 : i64} {
  func.func @_conv1x1_kernel(%arg0: i32, %arg1: i32, %arg2: memref<1x4x256xf32, #tpu.memory_space<vmem>>, %arg3: memref<3x4xf32, #tpu.memory_space<vmem>>, %arg4: memref<3x1xf32, #tpu.memory_space<vmem>>, %arg5: memref<1x3x256xf32, #tpu.memory_space<vmem>>) attributes {dimension_semantics = [#tpu.dimension_semantics<parallel>, #tpu.dimension_semantics<parallel>], iteration_bounds = array<i64: 2, 1>, scalar_prefetch = 0 : i64, scratch_operands = 0 : i64, tpu.core_type = #tpu.core_type<tc>, window_params = [{transform_indices = @transform_0, window_bounds = array<i64: 1, 4, 256>}, {pipeline_mode = #tpu.pipeline_mode<synchronous>, transform_indices = @transform_1, window_bounds = array<i64: 3, 4>}, {pipeline_mode = #tpu.pipeline_mode<synchronous>, transform_indices = @transform_2, window_bounds = array<i64: 3, 1>}, {transform_indices = @transform_3, window_bounds = array<i64: 1, 3, 256>}]} {
    %c0 = arith.constant 0 : index
    %c0_0 = arith.constant 0 : index
    %0 = vector.load %arg4[%c0, %c0_0] : memref<3x1xf32, #tpu.memory_space<vmem>>, vector<3x1xf32>
    %c0_1 = arith.constant 0 : index
    %c0_2 = arith.constant 0 : index
    %c0_3 = arith.constant 0 : index
    %1 = vector.load %arg2[%c0_1, %c0_2, %c0_3] : memref<1x4x256xf32, #tpu.memory_space<vmem>>, vector<1x4x256xf32>
    %2 = vector.shape_cast %1 : vector<1x4x256xf32> to vector<4x256xf32>
    %c0_4 = arith.constant 0 : index
    %c0_5 = arith.constant 0 : index
    %3 = vector.load %arg3[%c0_4, %c0_5] : memref<3x4xf32, #tpu.memory_space<vmem>>, vector<3x4xf32>
    %4 = vector.shape_cast %0 : vector<3x1xf32> to vector<3x1xf32>
    %5 = vector.broadcast %4 : vector<3x1xf32> to vector<3x256xf32>
    %6 = vector.extract_strided_slice %3 {offsets = [0, 0], sizes = [3, 1], strides = [1, 1]} : vector<3x4xf32> to vector<3x1xf32>
    %7 = vector.extract_strided_slice %2 {offsets = [0, 0], sizes = [1, 256], strides = [1, 1]} : vector<4x256xf32> to vector<1x256xf32>
    %8 = vector.broadcast %6 : vector<3x1xf32> to vector<3x256xf32>
    %9 = vector.broadcast %7 : vector<1x256xf32> to vector<3x256xf32>
    %10 = arith.mulf %8, %9 : vector<3x256xf32>
    %11 = arith.addf %5, %10 : vector<3x256xf32>
    %12 = vector.extract_strided_slice %3 {offsets = [0, 1], sizes = [3, 1], strides = [1, 1]} : vector<3x4xf32> to vector<3x1xf32>
    %13 = vector.extract_strided_slice %2 {offsets = [1, 0], sizes = [1, 256], strides = [1, 1]} : vector<4x256xf32> to vector<1x256xf32>
    %14 = vector.broadcast %12 : vector<3x1xf32> to vector<3x256xf32>
    %15 = vector.broadcast %13 : vector<1x256xf32> to vector<3x256xf32>
    %16 = arith.mulf %14, %15 : vector<3x256xf32>
    %17 = arith.addf %11, %16 : vector<3x256xf32>
    %18 = vector.extract_strided_slice %3 {offsets = [0, 2], sizes = [3, 1], strides = [1, 1]} : vector<3x4xf32> to vector<3x1xf32>
    %19 = vector.extract_strided_slice %2 {offsets = [2, 0], sizes = [1, 256], strides = [1, 1]} : vector<4x256xf32> to vector<1x256xf32>
    %20 = vector.broadcast %18 : vector<3x1xf32> to vector<3x256xf32>
    %21 = vector.broadcast %19 : vector<1x256xf32> to vector<3x256xf32>
    %22 = arith.mulf %20, %21 : vector<3x256xf32>
    %23 = arith.addf %17, %22 : vector<3x256xf32>
    %24 = vector.extract_strided_slice %3 {offsets = [0, 3], sizes = [3, 1], strides = [1, 1]} : vector<3x4xf32> to vector<3x1xf32>
    %25 = vector.extract_strided_slice %2 {offsets = [3, 0], sizes = [1, 256], strides = [1, 1]} : vector<4x256xf32> to vector<1x256xf32>
    %26 = vector.broadcast %24 : vector<3x1xf32> to vector<3x256xf32>
    %27 = vector.broadcast %25 : vector<1x256xf32> to vector<3x256xf32>
    %28 = arith.mulf %26, %27 : vector<3x256xf32>
    %29 = arith.addf %23, %28 : vector<3x256xf32>
    %c0_6 = arith.constant 0 : index
    %c0_7 = arith.constant 0 : index
    %c0_8 = arith.constant 0 : index
    %30 = vector.load %arg5[%c0_6, %c0_7, %c0_8] : memref<1x3x256xf32, #tpu.memory_space<vmem>>, vector<1x3x256xf32>
    %31 = vector.shape_cast %30 : vector<1x3x256xf32> to vector<3x256xf32>
    %32 = vector.shape_cast %29 : vector<3x256xf32> to vector<1x3x256xf32>
    tpu.vector_store %arg5[%c0_6, %c0_7, %c0_8], %32 {strides = array<i32>} : memref<1x3x256xf32, #tpu.memory_space<vmem>>, vector<1x3x256xf32>,
    return
  }
  func.func @transform_0(%arg0: i32, %arg1: i32) -> (i32, i32, i32) {
    %c0_i32 = arith.constant 0 : i32
    %c0_i32_0 = arith.constant 0 : i32
    return %arg0, %c0_i32, %arg1 : i32, i32, i32
  }
  func.func @transform_1(%arg0: i32, %arg1: i32) -> (i32, i32) {
    %c0_i32 = arith.constant 0 : i32
    %c0_i32_0 = arith.constant 0 : i32
    %c0_i32_1 = arith.constant 0 : i32
    return %c0_i32, %c0_i32_0 : i32, i32
  }
  func.func @transform_2(%arg0: i32, %arg1: i32) -> (i32, i32) {
    %c0_i32 = arith.constant 0 : i32
    %c0_i32_0 = arith.constant 0 : i32
    %c0_i32_1 = arith.constant 0 : i32
    return %c0_i32, %c0_i32_0 : i32, i32
  }
  func.func @transform_3(%arg0: i32, %arg1: i32) -> (i32, i32, i32) {
    %c0_i32 = arith.constant 0 : i32
    %c0_i32_0 = arith.constant 0 : i32
    return %arg0, %c0_i32, %arg1 : i32, i32, i32
  }
}

</mosaic_0001>

<bundles_post_ra>
// kernel: tpu_custom_call.1
= control target key start
LH: loop header
LB: loop body
LE: loop exit
PB: predicated region body
PF: predicated region fallthrough
CT: control target
= control target key end

     0   :  { %8 = vsyncpa [#allocation3], 0  ;;  %s668_s0 = inlined_call_operand.hbm [shape: f32[2,4,256], index: 0, kind: input, shape index: {}]   ;;  %s669_s1 = inlined_call_operand.vmem [shape: f32[3,4], index: 1, kind: input, shape index: {}]   ;;  %s670_s2 = inlined_call_operand.vmem [shape: f32[3,1], index: 2, kind: input, shape index: {}]   ;;  %s671_s3 = inlined_call_operand.vmem [shape: f32[2,3,256], index: 3, kind: output, shape index: {}]  }
   0x1   :  { %10 = vsyncpa [#allocation3 + $0x1], 0  ;;  %s572_s12 = smov 0   ;;  %s574_s13 = smov 0  }
   0x2   :  { %s576_s14 = smov 0   ;;  %s578_s15 = smov 0  }
   0x3   :  { %s580_s16 = smov 0   ;;  %s582_s17 = smov 0  }
   0x4 LB: > { %s387_s18 = sadd.s32 4294967295, %s546_s17   ;;  %s28_s19 = sadd.s32 1, %s542_s16  ;;  %s546_s17 = sphi %s582_s17, %s16_s17   ;;  %s542_s16 = sphi %s580_s16, %s678_s16   ;;  %s538_s15 = sphi %s578_s15, %s677_s15   ;;  %s534_s14 = sphi %s576_s14, %s676_s14   ;;  %s530_s13 = sphi %s574_s13, %s675_s13   ;;  %s526_s12 = sphi %s572_s12, %s674_s12  }
   0x5   : > { %p30_p0 = scmp.ge.s32.totalorder %s28_s19, 2  ;;  %s37_s20 = sadd.s32 1, %s534_s14 }
   0x6   : > { %p44_p1 = scmp.ne.s32.totalorder %s534_s14, %s530_s13  ;;  %p45_p2 = scmp.eq.s32.totalorder %s546_s17, 0 }
   0x7   : > { %s680_s19 = smov (%p30_p0, %s28_s19), 0  ;;  %p50_p4 = scmp.ne.s32.totalorder %s530_s13, %s526_s12 }
   0x8   : > { %p608_p3 = por %p45_p2, %p44_p1  ;;  %s32_s22 = ssub.s32 %s542_s16, %s680_s19 }
   0x9   : > { %p51_p5 = scmp.eq.s32.totalorder %s387_s18, 0  ;;  %p35_p6 = scmp.eq.s32.totalorder %s32_s22, 0 }
   0xa   : > { %p408_p8 = scmp.lt.s32.totalorder %s546_s17, 2  ;;  %s150_s25 = sand.u32 1, %s534_s14  }
   0xb   : > { %p615_p7 = por %p51_p5, %p50_p4  ;;  %s400_s26 = sshll.u32 %s542_s16, 3 }
   0xc   : > { %s621_s24 = scalar_select %p35_p6, %s534_s14, %s37_s20  }
   0xd   : > { %s391_s27 = sshll.u32 %s150_s25, 3  ;;  %s161_s30 = scalar_lea.hbm %s668_s0, %s400_s26 }
   0xe   : > { %s163_s4 = sshll.u32 %s161_s30, 4  ;;  %s154_s5 = scalar_lea.vmem [#allocation2], %s391_s27  ;;  %s164_s4 = int_to_ptr.hbm [resolvable:$true] %s163_s4 }
   0xf   : > { %s165_s6 = sshll.u32 %s154_s5, 4  ;;  %p405_p9 = pnand %p408_p8, %p608_p3  ;;  %s166_s6 = int_to_ptr.vmem [resolvable:$true] %s165_s6 }
  0x10   : > { %p394_p10 = scmp.ge.s32.totalorder %s546_s17, 1  ;;  %p170_p11 = scmp.lt.s32.totalorder %s546_s17, 3 }
  0x11   : > { %s151_s7 = scalar_lea.sflag [#allocation3], %s150_s25 }
  0x12   : > { %407 = dma.hbm_to_vmem [thread:$0]  (!%p405_p9), %s164_s4, 128, %s166_s6, %s151_s7  }
  0x13   : > { %p171_p12 = pnand %p394_p10, %p170_p11 }
  0x14   : > { %s176_s8 = sand.u32 (!%p171_p12), 1, %s530_s13  }
  0x15   : > { %174 = sbr.rel (%p171_p12) target bundleno = 164 (0xa4), region = 32  ;;  %s395_s9 = sshll.u32 (!%p171_p12), %s176_s8, 3 }
  0x16   : > { %s177_s10 = scalar_lea.sflag (!%p171_p12), [#allocation3], %s176_s8  ;;  %s180_s11 = scalar_lea.vmem (!%p171_p12), [#allocation2], %s395_s9 }
  0x1a   : > { %521 = dma.done.wait (%p615_p7), %s177_s10, 128  }
  0x1b   : > { %523 = vsyncadd (%p615_p7), %s177_s10, 4294967168  ;;  %v548_v0 = vmov 0   ;;  %v549_v1 = vmov 1   ;;  %v550_v2 = vmov 3   ;;  %v221_v3 = vld [vmem:[%s669_s1] sm:$0x7] }
  0x1c   : > { %461 = vset.pattern.permute.xlu0 %v548_v0  ;;  %462 = vset.pattern.permute.xlu1 %v549_v1  ;;  %v219_v4 = vld [vmem:[%s670_s2] sm:$0x7]  ;;  %v551_v5 = vmov 2   ;;  %p210_p13 = scmp.lt.s32.totalorder %s538_s15, 1  ;;  %vm288_vm0 = vcmask 1043456  }
  0x1d   : > { %464 = vset.pattern.permute.xlu2 %v550_v2  ;;  %229 = vperm.xlu0 %461, %v221_v3   ;;  %v220_v6 = vld [vmem:[%s180_s11] sm:$0xff] }
  0x1e   : > { %244 = vperm.xlu1 %462, %v221_v3   ;;  %272 = vperm.xlu2 %464, %v221_v3   ;;  %v233_v7 = vperm.slane %v220_v6, 0  ;;  %v234_v8 = vperm.slane %v220_v6, 4  ;;  %v247_v11 = vperm.slane %v220_v6, 1  ;;  %v248_v12 = vperm.slane %v220_v6, 5  ;;  %s682_s15 = smov (!%p210_p13, %s538_s15), 1 }
  0x1f   : > { %v261_v13 = vperm.slane %v220_v6, 2  ;;  %v262_v14 = vperm.slane %v220_v6, 6  ;;  %v276_v17 = vperm.slane %v220_v6, 7  ;;  %v275_v18 = vperm.slane %v220_v6, 3  ;;  %s401_s22 = sshll.u32 %s682_s15, 3 }
  0x20   : > { %v237_v15 = vperm.slane %v233_v7, 0  ;;  %v238_v16 = vperm.slane %v234_v8, 0  ;;  %v251_v19 = vperm.slane %v247_v11, 1  ;;  %v252_v20 = vperm.slane %v248_v12, 1  ;;  %s217_s26 = scalar_lea.vmem %s671_s3, %s401_s22 }
  0x21   : > { %v265_v21 = vperm.slane %v261_v13, 2  ;;  %v266_v22 = vperm.slane %v262_v14, 2  ;;  %v280_v25 = vperm.slane %v276_v17, 3  ;;  %v279_v28 = vperm.slane %v275_v18, 3 }
  0x25   : > { %224 = vperm.xlu0 %461, %v219_v4  }
  0x26   : > { %463 = vset.pattern.permute.xlu1 %v551_v5 }
  0x27   : > { %258 = vperm.xlu1 %463, %v221_v3  }
  0x2d   : > { %465 = vset.pattern.permute.xlu0 %v550_v2 }
  0x78   : > { %v273_v27 = vpop.permute.xlu2 %272 }
  0x79   : > { %v282_v38 = vmul.f32 %v280_v25, %v273_v27  ;;  %v281_v41 = vmul.f32 %v279_v28, %v273_v27 }
  0x8f   : > { %v230_v9 = vpop.permute.xlu0 %229 }
  0x90   : > { %v245_v10 = vpop.permute.xlu1 %244  ;;  %v239_v23 = vmul.f32 %v237_v15, %v230_v9  ;;  %v240_v24 = vmul.f32 %v238_v16, %v230_v9 }
  0x91   : > { %v253_v29 = vmul.f32 %v251_v19, %v245_v10  ;;  %v254_v30 = vmul.f32 %v252_v20, %v245_v10 }
  0x97   : > { %v225_v26 = vpop.permute.xlu0 %224 }
  0x98   : > { %v241_v31 = vadd.f32 %v239_v23, %v225_v26  ;;  %v242_v32 = vadd.f32 %v240_v24, %v225_v26 }
  0x99   : > { %v259_v33 = vpop.permute.xlu1 %258 }
  0x9a   : > { %v267_v34 = vmul.f32 %v265_v21, %v259_v33  ;;  %v268_v35 = vmul.f32 %v266_v22, %v259_v33  ;;  %v255_v36 = vadd.f32 %v253_v29, %v241_v31  ;;  %v256_v37 = vadd.f32 %v254_v30, %v242_v32 }
  0x9c   : > { %v269_v39 = vadd.f32 %v267_v34, %v255_v36  ;;  %v270_v40 = vadd.f32 %v268_v35, %v256_v37 }
  0x9e   : > { %v284_v42 = vadd.f32 %v282_v38, %v270_v40  ;;  %v283_v43 = vadd.f32 %v281_v41, %v269_v39 }
  0xa0   : > { %v287_v44 = vrot.slane %v284_v42, 4 }
  0xa2   : > { %v289_v45 = vsel %vm288_vm0, %v283_v43, %v287_v44 }
  0xa3   : > { %291 = vst [vmem:[%s217_s26] sm:$0x77] %v289_v45 }
  0xa4 PF: > { %s16_s17 = sadd.s32 1, %s546_s17   ;;  %s674_s12 = smov %s530_s13 }
  0xa5   : > { %p13_p0 = scmp.ge.s32.totalorder %s16_s17, 4   ;;  %s675_s13 = smov %s534_s14 }
  0xa6   : > { %s676_s14 = smov %s621_s24  ;;  %s677_s15 = smov %s542_s16 }
  0xa7   : > { %s678_s16 = smov %s680_s19  ;;  %15 = sbr.rel (!%p13_p0) target bundleno = 4 (0x4), region = 72 }
  0xac   :  { %322 = vsyncpa [#allocation3], 1 }
  0xad   :  { %324 = vsyncpa [#allocation3 + $0x1], 1 }

</bundles_post_ra>
